<compile_context>
chip_gen: v6e
topology: v6e:2x2x1
jax: 0.10.0
libtpu: 0.0.40
codegen_flags: <defaults>
</compile_context>

<pallas_src>
import jax
import jax.numpy as jnp
from jax import lax
from jax.experimental import pallas as pl
from jax.experimental.pallas import tpu as pltpu


def _round_up(x, m):
    return ((x + m - 1) // m) * m


def _tpu_generation():
    """Best-effort TPU generation detection: 'v5' | 'v6' | 'v7' | None."""
    try:
        kind = jax.devices()[0].device_kind.lower()
    except Exception:
        return None
    for g in ("v7", "v6", "v5"):
        if g in kind:
            return g
    return None


# ---------------------------------------------------------------------------
# Kernel factory: encoder forward pass for a block of Bblk images.
# ---------------------------------------------------------------------------
def _make_encoder_kernel(n_true, n_pad, mlp_chunk, gelu_dtype):
    def encoder_kernel(x_ref,      # (Bblk, Np, PDp)  bf16 patches
                       we_ref,     # (PDp, Dp)        bf16 patch-embed weight
                       be_ref,     # (1, Dp)          f32  patch-embed bias
                       w1_ref,     # (Dp, Dmp)        bf16 MLP up-proj
                       b1_ref,     # (1, Dmp)         f32
                       w2_ref,     # (Dmp, Dp)        bf16 MLP down-proj
                       b2_ref,     # (1, Dp)          f32
                       wp_ref,     # (Dp, Fp)         bf16 final projection
                       bp_ref,     # (1, Fp)          f32
                       o_ref):     # (Bblk, Fp)       f32 L2-normalized features
        Bblk = x_ref.shape[0]
        PDp = x_ref.shape[2]
        Dp = we_ref.shape[1]
        Dmp = w1_ref.shape[1]

        # Flatten the image block so every matmul sees M = Bblk*Np rows.
        # Free reshape: Np is a multiple of 16 (bf16 sublane packing).
        x = x_ref[...].reshape(Bblk * n_pad, PDp)

        # Patch embedding (conv with stride=patch expressed as matmul).
        # bf16 operands, f32 accumulation on the MXU.
        h = jnp.dot(x, we_ref[...], preferred_element_type=jnp.float32) + be_ref[...]

        # Residual MLP block, chunked over the hidden dim so the f32 intermediate
        # stays small (VMEM-friendly on v7x). Single chunk at small Dmp.
        h_bf = h.astype(jnp.bfloat16)
        h_out = h + b2_ref[...]
        n_chunks = Dmp // mlp_chunk
        for c in range(n_chunks):
            lo = c * mlp_chunk
            hi = lo + mlp_chunk
            m = jnp.dot(h_bf, w1_ref[:, lo:hi],
                        preferred_element_type=jnp.float32) + b1_ref[:, lo:hi]
            # NOTE: PyTorch nn.GELU defaults to exact erf-GELU; backbone here is
            # synthetic, so we keep the tanh form (EUP). bf16 GELU on v6e/v7x,
            # f32 on v5e (no bf16 VPU/EUP there).
            m = jax.nn.gelu(m.astype(gelu_dtype))
            h_out = h_out + jnp.dot(m.astype(jnp.bfloat16), w2_ref[lo:hi, :],
                                    preferred_element_type=jnp.float32)
        h = h_out                                                   # (Bblk*Np, Dp) f32

        # Global mean pool over the TRUE patch count. Free reshape: Np % 8 == 0.
        h3 = h.reshape(Bblk, n_pad, Dp)
        if n_pad != n_true:
            # Padded patch rows carry bias-only garbage -> mask them out of the pool.
            mask = lax.broadcasted_iota(jnp.int32, (1, n_pad, 1), 1) < n_true
            h3 = jnp.where(mask, h3, 0.0)
        pooled = jnp.sum(h3, axis=1) * jnp.float32(1.0 / n_true)    # (Bblk, Dp)

        # One batched (Bblk, Dp) @ (Dp, Fp) projection.
        feat = jnp.dot(pooled.astype(jnp.bfloat16), wp_ref[...],
                       preferred_element_type=jnp.float32) + bp_ref[...]

        # F.normalize(dim=-1): x * rsqrt(max(||x||^2, eps^2)); rsqrt -> EUP slot.
        sq = jnp.sum(feat * feat, axis=-1, keepdims=True)
        o_ref[...] = feat * lax.rsqrt(jnp.maximum(sq, 1e-24))

    return encoder_kernel


# ---------------------------------------------------------------------------
# Wrapper: patch extraction + padding glue + pallas_call.
# ---------------------------------------------------------------------------
def image_encoder_forward(image, params, *, patch_size,
                          block_b=None, lane=None, vmem_limit_bytes=None):
    """image: (B, C, H, W) float32 (NCHW, like PyTorch). Returns (B, FEAT) f32."""
    B, C, H, W = image.shape
    P = patch_size
    assert H % P == 0 and W % P == 0
    nH, nW = H // P, W // P
    N = nH * nW
    PD = C * P * P

    # Generation-aware defaults.
    gen = _tpu_generation()
    if lane is None:
        lane = 256 if gen in ("v6", "v7") else 128      # 2x256 MXU on v6e/v7x, 4x128 on v5e
    if block_b is None:
        block_b = 8 if gen == "v7" else 16               # smaller working set on v7x (64 MiB VMEM)
    if vmem_limit_bytes is None:
        vmem_limit_bytes = (48 if gen == "v7" else 64) * 1024 * 1024
    gelu_dtype = jnp.bfloat16 if gen in ("v6", "v7") else jnp.float32

    we, be, w1, b1, w2, b2, wp, bp = params
    D, Dm, Fd = we.shape[1], w1.shape[1], wp.shape[1]

    # Lane-dense padded dims: unmasked vector stores, MXU-aligned matmul K/N.
    PDp = _round_up(PD, lane)
    Dp = _round_up(D, lane)
    Dmp = _round_up(Dm, lane)
    Fp = _round_up(Fd, lane)
    # Pad patch count so in-kernel reshapes never cross (8/16,128) tile boundaries.
    Np = _round_up(N, 16)

    # Bblk: multiple of 8 (full f32 output tile), Bp a multiple of Bblk.
    Bblk = max(8, _round_up(min(block_b, max(B, 1)), 8))
    Bp = _round_up(B, Bblk)

    # MLP hidden-dim chunk: largest divisor of Dmp that is <= 512 (Dmp % lane == 0).
    if Dmp <= 512:
        mlp_chunk = Dmp
    elif Dmp % 512 == 0:
        mlp_chunk = 512
    elif Dmp % 256 == 0:
        mlp_chunk = 256
    else:
        mlp_chunk = 128

    # NCHW -> (B, N, C*P*P) patches in bf16 (half-size HBM intermediate), then
    # zero-pad batch / patch-count / patch-dim.
    # TODO(synk): fold patch extraction into the kernel's BlockSpec/index_map to
    # avoid this HBM round-trip of the patch tensor entirely.
    x = image.astype(jnp.bfloat16)
    x = x.reshape(B, C, nH, P, nW, P).transpose(0, 2, 4, 1, 3, 5)
    x = x.reshape(B, N, PD)
    x = jnp.pad(x, ((0, Bp - B), (0, Np - N), (0, PDp - PD)))

    # Zero-pad weights/biases. Zero padding keeps the math identical to the
    # unpadded model: padded feature columns stay exactly 0 end-to-end, so the
    # L2 norm and the sliced output are unchanged.
    def pad2(a, r, c):
        return jnp.pad(a, ((0, r - a.shape[0]), (0, c - a.shape[1])))

    we_p = pad2(we, PDp, Dp).astype(jnp.bfloat16)   # bf16 weights: native MXU dtype
    w1_p = pad2(w1, Dp, Dmp).astype(jnp.bfloat16)
    w2_p = pad2(w2, Dmp, Dp).astype(jnp.bfloat16)
    wp_p = pad2(wp, Dp, Fp).astype(jnp.bfloat16)
    be_p = pad2(be, 1, Dp).astype(jnp.float32)      # biases stay f32 (added post-acc)
    b1_p = pad2(b1, 1, Dmp).astype(jnp.float32)
    b2_p = pad2(b2, 1, Dp).astype(jnp.float32)
    bp_p = pad2(bp, 1, Fp).astype(jnp.float32)

    # Grid-invariant weights/biases: constant index_map + single buffer
    # (double-buffering them is pure VMEM waste).
    def const_spec(shape):
        return pl.BlockSpec(shape, lambda b: (0,) * len(shape),
                            pipeline_mode=pl.Buffered(1))

    # Advisory cost estimate so XLA schedules surrounding HBM traffic correctly.
    flops = 2 * Bp * Np * (PDp * Dp + 2 * Dp * Dmp) + 2 * Bp * Dp * Fp
    bytes_accessed = (x.size * 2
                      + (PDp * Dp + Dp * Dmp + Dmp * Dp + Dp * Fp) * 2
                      + (Dp + Dmp + Dp + Fp) * 4
                      + Bp * Fp * 4)
    cost = pl.CostEstimate(flops=flops,
                           transcendentals=Bp * Np * Dmp,
                           bytes_accessed=bytes_accessed)

    kernel = _make_encoder_kernel(N, Np, mlp_chunk, gelu_dtype)

    out = pl.pallas_call(
        kernel,
        out_shape=jax.ShapeDtypeStruct((Bp, Fp), jnp.float32),
        grid_spec=pltpu.PrefetchScalarGridSpec(
            num_scalar_prefetch=0,
            grid=(Bp // Bblk,),
            in_specs=[
                pl.BlockSpec((Bblk, Np, PDp), lambda b: (b, 0, 0)),
                const_spec((PDp, Dp)), const_spec((1, Dp)),
                const_spec((Dp, Dmp)), const_spec((1, Dmp)),
                const_spec((Dmp, Dp)), const_spec((1, Dp)),
                const_spec((Dp, Fp)), const_spec((1, Fp)),
            ],
            out_specs=pl.BlockSpec((Bblk, Fp), lambda b: (b, 0)),
        ),
        compiler_params=pltpu.CompilerParams(
            dimension_semantics=("parallel",),
            vmem_limit_bytes=vmem_limit_bytes,
        ),
        cost_estimate=cost,
    )(x, we_p, be_p, w1_p, b1_p, w2_p, b2_p, wp_p, bp_p)

    # Strip batch / feature padding (padded feature columns are exactly zero).
    return out[:B, :Fd]


def init_params(key, *, patch_dim, hidden, mlp_dim, feat_dim):
    ks = jax.random.split(key, 8)
    s = lambda k, shape, fan_in: (jax.random.normal(k, shape, jnp.float32)
                                  / jnp.sqrt(jnp.float32(fan_in)))
    we = s(ks[0], (patch_dim, hidden), patch_dim)
    be = 0.01 * jax.random.normal(ks[1], (1, hidden), jnp.float32)
    w1 = s(ks[2], (hidden, mlp_dim), hidden)
    b1 = 0.01 * jax.random.normal(ks[3], (1, mlp_dim), jnp.float32)
    w2 = s(ks[4], (mlp_dim, hidden), mlp_dim)
    b2 = 0.01 * jax.random.normal(ks[5], (1, hidden), jnp.float32)
    wp = s(ks[6], (hidden, feat_dim), hidden)
    bp = 0.01 * jax.random.normal(ks[7], (1, feat_dim), jnp.float32)
    return (we, be, w1, b1, w2, b2, wp, bp)


if __name__ == "__main__":
    key = jax.random.PRNGKey(0)
    k_img, k_par = jax.random.split(key)

    # Small, module-consistent shapes: batch=2, channels=4, spatial=16x16.
    B, C, H, W = 2, 4, 16, 16
    PATCH = 4
    HIDDEN, MLP, FEAT = 32, 64, 32

    image = jax.random.normal(k_img, (B, C, H, W), jnp.float32)
    params = init_params(k_par,
                         patch_dim=C * PATCH * PATCH,
                         hidden=HIDDEN, mlp_dim=MLP, feat_dim=FEAT)

    feats = image_encoder_forward(image, params, patch_size=PATCH)
    feats = jax.block_until_ready(feats)

    # Sanity: output is (B, FEAT) and L2-normalized along dim=-1
    # (bf16 matmul operands -> allow a loose tolerance on the norm).
    assert feats.shape == (B, FEAT)
    norms = jnp.linalg.norm(feats, axis=-1)
    assert bool(jnp.all(jnp.abs(norms - 1.0) < 1e-3))

    print("KERNEL_OK")
</pallas_src>

<mosaic_0001>
module attributes {stable_mosaic.version = 11 : i64} {
  func.func @encoder_kernel(%arg0: i32, %arg1: memref<8x16x128xbf16, #tpu.memory_space<vmem>>, %arg2: memref<128x128xbf16, #tpu.memory_space<vmem>>, %arg3: memref<1x128xf32, #tpu.memory_space<vmem>>, %arg4: memref<128x128xbf16, #tpu.memory_space<vmem>>, %arg5: memref<1x128xf32, #tpu.memory_space<vmem>>, %arg6: memref<128x128xbf16, #tpu.memory_space<vmem>>, %arg7: memref<1x128xf32, #tpu.memory_space<vmem>>, %arg8: memref<128x128xbf16, #tpu.memory_space<vmem>>, %arg9: memref<1x128xf32, #tpu.memory_space<vmem>>, %arg10: memref<8x128xf32, #tpu.memory_space<vmem>>) attributes {dimension_semantics = [#tpu.dimension_semantics<parallel>], iteration_bounds = array<i64: 1>, scalar_prefetch = 0 : i64, scratch_operands = 0 : i64, tpu.core_type = #tpu.core_type<tc>, window_params = [{transform_indices = @transform_0, window_bounds = array<i64: 8, 16, 128>}, {pipeline_mode = #tpu.pipeline_mode<synchronous>, transform_indices = @transform_1, window_bounds = array<i64: 128, 128>}, {pipeline_mode = #tpu.pipeline_mode<synchronous>, transform_indices = @transform_2, window_bounds = array<i64: 1, 128>}, {pipeline_mode = #tpu.pipeline_mode<synchronous>, transform_indices = @transform_3, window_bounds = array<i64: 128, 128>}, {pipeline_mode = #tpu.pipeline_mode<synchronous>, transform_indices = @transform_4, window_bounds = array<i64: 1, 128>}, {pipeline_mode = #tpu.pipeline_mode<synchronous>, transform_indices = @transform_5, window_bounds = array<i64: 128, 128>}, {pipeline_mode = #tpu.pipeline_mode<synchronous>, transform_indices = @transform_6, window_bounds = array<i64: 1, 128>}, {pipeline_mode = #tpu.pipeline_mode<synchronous>, transform_indices = @transform_7, window_bounds = array<i64: 128, 128>}, {pipeline_mode = #tpu.pipeline_mode<synchronous>, transform_indices = @transform_8, window_bounds = array<i64: 1, 128>}, {transform_indices = @transform_9, window_bounds = array<i64: 8, 128>}]} {
    %c0 = arith.constant 0 : index
    %c0_0 = arith.constant 0 : index
    %c0_1 = arith.constant 0 : index
    %0 = vector.load %arg1[%c0, %c0_0, %c0_1] : memref<8x16x128xbf16, #tpu.memory_space<vmem>>, vector<8x16x128xbf16>
    %1 = vector.shape_cast %0 : vector<8x16x128xbf16> to vector<128x128xbf16>
    %c0_2 = arith.constant 0 : index
    %c0_3 = arith.constant 0 : index
    %2 = vector.load %arg2[%c0_2, %c0_3] : memref<128x128xbf16, #tpu.memory_space<vmem>>, vector<128x128xbf16>
    %cst = arith.constant dense<0.000000e+00> : vector<128x128xf32>
    %3 = tpu.matmul %1, %2, %cst {dimension_numbers = #tpu.dot_dimension_numbers<[1], [0], [0], [1], [0, 0, 1, 1], [], []>} : vector<128x128xbf16>, vector<128x128xbf16>, vector<128x128xf32> -> vector<128x128xf32>
    %c0_4 = arith.constant 0 : index
    %c0_5 = arith.constant 0 : index
    %4 = vector.load %arg3[%c0_4, %c0_5] : memref<1x128xf32, #tpu.memory_space<vmem>>, vector<1x128xf32>
    %5 = vector.broadcast %4 : vector<1x128xf32> to vector<128x128xf32>
    %6 = arith.addf %3, %5 : vector<128x128xf32>
    %7 = arith.truncf %6 : vector<128x128xf32> to vector<128x128xbf16>
    %c0_6 = arith.constant 0 : index
    %c0_7 = arith.constant 0 : index
    %8 = vector.load %arg7[%c0_6, %c0_7] : memref<1x128xf32, #tpu.memory_space<vmem>>, vector<1x128xf32>
    %9 = vector.broadcast %8 : vector<1x128xf32> to vector<128x128xf32>
    %10 = arith.addf %6, %9 : vector<128x128xf32>
    %c0_8 = arith.constant 0 : index
    %c0_9 = arith.constant 0 : index
    %11 = vector.load %arg4[%c0_8, %c0_9] : memref<128x128xbf16, #tpu.memory_space<vmem>>, vector<128x128xbf16>
    %cst_10 = arith.constant dense<0.000000e+00> : vector<128x128xf32>
    %12 = tpu.matmul %7, %11, %cst_10 {dimension_numbers = #tpu.dot_dimension_numbers<[1], [0], [0], [1], [0, 0, 1, 1], [], []>} : vector<128x128xbf16>, vector<128x128xbf16>, vector<128x128xf32> -> vector<128x128xf32>
    %c0_11 = arith.constant 0 : index
    %c0_12 = arith.constant 0 : index
    %13 = vector.load %arg5[%c0_11, %c0_12] : memref<1x128xf32, #tpu.memory_space<vmem>>, vector<1x128xf32>
    %14 = vector.broadcast %13 : vector<1x128xf32> to vector<128x128xf32>
    %15 = arith.addf %12, %14 : vector<128x128xf32>
    %16 = arith.mulf %15, %15 : vector<128x128xf32>
    %17 = arith.mulf %15, %16 : vector<128x128xf32>
    %cst_13 = arith.constant 4.471500e-02 : f32
    %18 = vector.broadcast %cst_13 : f32 to vector<128x128xf32>
    %19 = arith.mulf %18, %17 : vector<128x128xf32>
    %20 = arith.addf %15, %19 : vector<128x128xf32>
    %cst_14 = arith.constant 0.797884583 : f32
    %21 = vector.broadcast %cst_14 : f32 to vector<128x128xf32>
    %22 = arith.mulf %21, %20 : vector<128x128xf32>
    %23 = math.tanh %22 : vector<128x128xf32>
    %cst_15 = arith.constant 1.000000e+00 : f32
    %24 = vector.broadcast %cst_15 : f32 to vector<128x128xf32>
    %25 = arith.addf %24, %23 : vector<128x128xf32>
    %cst_16 = arith.constant 5.000000e-01 : f32
    %26 = vector.broadcast %cst_16 : f32 to vector<128x128xf32>
    %27 = arith.mulf %26, %25 : vector<128x128xf32>
    %28 = arith.mulf %15, %27 : vector<128x128xf32>
    %29 = arith.truncf %28 : vector<128x128xf32> to vector<128x128xbf16>
    %c0_17 = arith.constant 0 : index
    %c0_18 = arith.constant 0 : index
    %30 = vector.load %arg6[%c0_17, %c0_18] : memref<128x128xbf16, #tpu.memory_space<vmem>>, vector<128x128xbf16>
    %cst_19 = arith.constant dense<0.000000e+00> : vector<128x128xf32>
    %31 = tpu.matmul %29, %30, %cst_19 {dimension_numbers = #tpu.dot_dimension_numbers<[1], [0], [0], [1], [0, 0, 1, 1], [], []>} : vector<128x128xbf16>, vector<128x128xbf16>, vector<128x128xf32> -> vector<128x128xf32>
    %32 = arith.addf %10, %31 : vector<128x128xf32>
    %33 = vector.shape_cast %32 : vector<128x128xf32> to vector<8x16x128xf32>
    %cst_20 = arith.constant dense<0.000000e+00> : vector<8x128xf32>
    %34 = vector.multi_reduction <add>, %33, %cst_20 [1] : vector<8x16x128xf32> to vector<8x128xf32>
    %cst_21 = arith.constant 6.250000e-02 : f32
    %35 = vector.broadcast %cst_21 : f32 to vector<8x128xf32>
    %36 = arith.mulf %34, %35 : vector<8x128xf32>
    %37 = arith.truncf %36 : vector<8x128xf32> to vector<8x128xbf16>
    %c0_22 = arith.constant 0 : index
    %c0_23 = arith.constant 0 : index
    %38 = vector.load %arg8[%c0_22, %c0_23] : memref<128x128xbf16, #tpu.memory_space<vmem>>, vector<128x128xbf16>
    %cst_24 = arith.constant dense<0.000000e+00> : vector<8x128xf32>
    %39 = tpu.matmul %37, %38, %cst_24 {dimension_numbers = #tpu.dot_dimension_numbers<[1], [0], [0], [1], [0, 0, 1, 1], [], []>} : vector<8x128xbf16>, vector<128x128xbf16>, vector<8x128xf32> -> vector<8x128xf32>
    %c0_25 = arith.constant 0 : index
    %c0_26 = arith.constant 0 : index
    %40 = vector.load %arg9[%c0_25, %c0_26] : memref<1x128xf32, #tpu.memory_space<vmem>>, vector<1x128xf32>
    %41 = vector.broadcast %40 : vector<1x128xf32> to vector<8x128xf32>
    %42 = arith.addf %39, %41 : vector<8x128xf32>
    %43 = arith.mulf %42, %42 : vector<8x128xf32>
    %cst_27 = arith.constant dense<0.000000e+00> : vector<8xf32>
    %44 = vector.multi_reduction <add>, %43, %cst_27 [1] : vector<8x128xf32> to vector<8xf32>
    %45 = vector.shape_cast %44 : vector<8xf32> to vector<8x1xf32>
    %cst_28 = arith.constant 1.000000e-24 : f32
    %46 = vector.broadcast %cst_28 : f32 to vector<8x1xf32>
    %47 = arith.maximumf %45, %46 : vector<8x1xf32>
    %48 = math.rsqrt %47 : vector<8x1xf32>
    %49 = vector.broadcast %48 : vector<8x1xf32> to vector<8x128xf32>
    %50 = arith.mulf %42, %49 : vector<8x128xf32>
    %c0_29 = arith.constant 0 : index
    %c0_30 = arith.constant 0 : index
    %51 = vector.load %arg10[%c0_29, %c0_30] : memref<8x128xf32, #tpu.memory_space<vmem>>, vector<8x128xf32>
    tpu.vector_store %arg10[%c0_29, %c0_30], %50 {strides = array<i32>} : memref<8x128xf32, #tpu.memory_space<vmem>>, vector<8x128xf32>,
    return
  }
  func.func @transform_0(%arg0: i32) -> (i32, i32, i32) {
    %c0_i32 = arith.constant 0 : i32
    %c0_i32_0 = arith.constant 0 : i32
    %c0_i32_1 = arith.constant 0 : i32
    return %arg0, %c0_i32, %c0_i32_0 : i32, i32, i32
  }
  func.func @transform_1(%arg0: i32) -> (i32, i32) {
    %c0_i32 = arith.constant 0 : i32
    %c0_i32_0 = arith.constant 0 : i32
    %c0_i32_1 = arith.constant 0 : i32
    return %c0_i32, %c0_i32_0 : i32, i32
  }
  func.func @transform_2(%arg0: i32) -> (i32, i32) {
    %c0_i32 = arith.constant 0 : i32
    %c0_i32_0 = arith.constant 0 : i32
    %c0_i32_1 = arith.constant 0 : i32
    return %c0_i32, %c0_i32_0 : i32, i32
  }
  func.func @transform_3(%arg0: i32) -> (i32, i32) {
    %c0_i32 = arith.constant 0 : i32
    %c0_i32_0 = arith.constant 0 : i32
    %c0_i32_1 = arith.constant 0 : i32
    return %c0_i32, %c0_i32_0 : i32, i32
  }
  func.func @transform_4(%arg0: i32) -> (i32, i32) {
    %c0_i32 = arith.constant 0 : i32
    %c0_i32_0 = arith.constant 0 : i32
    %c0_i32_1 = arith.constant 0 : i32
    return %c0_i32, %c0_i32_0 : i32, i32
  }
  func.func @transform_5(%arg0: i32) -> (i32, i32) {
    %c0_i32 = arith.constant 0 : i32
    %c0_i32_0 = arith.constant 0 : i32
    %c0_i32_1 = arith.constant 0 : i32
    return %c0_i32, %c0_i32_0 : i32, i32
  }
  func.func @transform_6(%arg0: i32) -> (i32, i32) {
    %c0_i32 = arith.constant 0 : i32
    %c0_i32_0 = arith.constant 0 : i32
    %c0_i32_1 = arith.constant 0 : i32
    return %c0_i32, %c0_i32_0 : i32, i32
  }
  func.func @transform_7(%arg0: i32) -> (i32, i32) {
    %c0_i32 = arith.constant 0 : i32
    %c0_i32_0 = arith.constant 0 : i32
    %c0_i32_1 = arith.constant 0 : i32
    return %c0_i32, %c0_i32_0 : i32, i32
  }
  func.func @transform_8(%arg0: i32) -> (i32, i32) {
    %c0_i32 = arith.constant 0 : i32
    %c0_i32_0 = arith.constant 0 : i32
    %c0_i32_1 = arith.constant 0 : i32
    return %c0_i32, %c0_i32_0 : i32, i32
  }
  func.func @transform_9(%arg0: i32) -> (i32, i32) {
    %c0_i32 = arith.constant 0 : i32
    %c0_i32_0 = arith.constant 0 : i32
    return %arg0, %c0_i32 : i32, i32
  }
}

</mosaic_0001>

<bundles_post_ra>
// kernel: tpu_custom_call.1
= control target key start
LH: loop header
LB: loop body
LE: loop exit
PB: predicated region body
PF: predicated region fallthrough
CT: control target
= control target key end

     0   :  { %14 = vsyncpa [#allocation3], 0  ;;  %s1847_s0 = inlined_call_operand.hbm [shape: bf16[8,16,128], index: 0, kind: input, shape index: {}]   ;;  %s1848_s1 = inlined_call_operand.hbm [shape: bf16[128,128], index: 1, kind: input, shape index: {}]   ;;  %s1849_s2 = inlined_call_operand.vmem [shape: f32[1,128], index: 2, kind: input, shape index: {}]   ;;  %s1850_s3 = inlined_call_operand.hbm [shape: bf16[128,128], index: 3, kind: input, shape index: {}]   ;;  %s1851_s4 = inlined_call_operand.vmem [shape: f32[1,128], index: 4, kind: input, shape index: {}]   ;;  %s1852_s5 = inlined_call_operand.hbm [shape: bf16[128,128], index: 5, kind: input, shape index: {}]   ;;  %s1853_s6 = inlined_call_operand.vmem [shape: f32[1,128], index: 6, kind: input, shape index: {}]   ;;  %s1854_s7 = inlined_call_operand.hbm [shape: bf16[128,128], index: 7, kind: input, shape index: {}]   ;;  %s1855_s8 = inlined_call_operand.vmem [shape: f32[1,128], index: 8, kind: input, shape index: {}]   ;;  %s1856_s9 = inlined_call_operand.hbm [shape: f32[8,128], index: 9, kind: output, shape index: {}]  }
   0x1   :  { %15 = vsyncpa [#allocation6], 0 }
   0x2   :  { %16 = vsyncpa [#allocation9], 0 }
   0x3   :  { %17 = vsyncpa [#allocation4], 0  ;;  %s1530_s30 = smov [#allocation5]   ;;  %s1531_s11 = smov [#allocation8]  }
   0x4   :  { %s35_s10 = sshll.u32 %s1530_s30, 4  ;;  %s63_s12 = sshll.u32 %s1531_s11, 4  ;;  %s36_s10 = int_to_ptr.vmem [resolvable:$true] %s35_s10  ;;  %s64_s12 = int_to_ptr.vmem [resolvable:$true] %s63_s12 }
   0x5   :  { %s1410_s13 = scalar_lea.vmem %s36_s10, 1024  ;;  %p1415_p1 = scmp.lt.s32.totalorder %s36_s10, %s36_s10 }
   0x6   :  { %p1411_p0 = scmp.ne.s32.totalorder %s36_s10, %s1410_s13  ;;  %p1416_p2 = scmp.lt.s32.totalorder %s1410_s13, %s1410_s13 }
   0x8   :  { %p1417_p3 = por %p1416_p2, %p1415_p1 }
   0xa   :  { %p1418_p4 = pnand %p1417_p3, %p1411_p0 }
   0xc   :  { %1421 = shalt.err (!%p1418_p4)
}
   0xd   :  { %s1532_s14 = smov 64   ;;  %s1533_s15 = smov 4  }
   0xe   :  { %41 = dma.hbm_to_vmem [thread:$0]  %s1848_s1, 1024, %s36_s10, [#allocation6], %s1532_s14, %s1532_s14, %s1533_s15  }
   0xf   :  { %s1430_s18 = scalar_lea.vmem %s64_s12, 1024  ;;  %p1435_p6 = scmp.lt.s32.totalorder %s64_s12, %s64_s12 }
  0x10   :  { %p1431_p5 = scmp.ne.s32.totalorder %s64_s12, %s1430_s18  ;;  %p1436_p7 = scmp.lt.s32.totalorder %s1430_s18, %s1430_s18 }
  0x12   :  { %p1437_p8 = por %p1436_p7, %p1435_p6 }
  0x14   :  { %p1438_p9 = pnand %p1437_p8, %p1431_p5 }
  0x16   :  { %1441 = shalt.err (!%p1438_p9)
}
  0x17   :  { %69 = dma.hbm_to_vmem [thread:$0]  %s1852_s5, 1024, %s64_s12, [#allocation9], %s1532_s14, %s1532_s14, %s1533_s15  }
  0x18   :  { %s1534_s21 = smov [#allocation2]   ;;  %s1535_s23 = smov [#allocation7]  }
  0x19   :  { %s23_s22 = sshll.u32 %s1534_s21, 4  ;;  %s49_s24 = sshll.u32 %s1535_s23, 4  ;;  %s24_s22 = int_to_ptr.vmem [resolvable:$true] %s23_s22  ;;  %s50_s24 = int_to_ptr.vmem [resolvable:$true] %s49_s24 }
  0x1a   :  { %s1450_s1 = scalar_lea.vmem %s24_s22, 1024  ;;  %p1455_p11 = scmp.lt.s32.totalorder %s24_s22, %s24_s22 }
  0x1b   :  { %p1451_p10 = scmp.ne.s32.totalorder %s24_s22, %s1450_s1  ;;  %p1456_p12 = scmp.lt.s32.totalorder %s1450_s1, %s1450_s1 }
  0x1d   :  { %p1457_p13 = por %p1456_p12, %p1455_p11 }
  0x1f   :  { %p1458_p0 = pnand %p1457_p13, %p1451_p10 }
  0x21   :  { %1461 = shalt.err (!%p1458_p0)
}
  0x22   :  { %29 = dma.hbm_to_vmem [thread:$0]  %s1847_s0, 1024, %s24_s22, [#allocation3], %s1532_s14, %s1532_s14, %s1533_s15  }
  0x23   :  { %s1470_s5 = scalar_lea.vmem %s50_s24, 1024  ;;  %p1475_p2 = scmp.lt.s32.totalorder %s50_s24, %s50_s24 }
  0x24   :  { %p1471_p1 = scmp.ne.s32.totalorder %s50_s24, %s1470_s5  ;;  %p1476_p3 = scmp.lt.s32.totalorder %s1470_s5, %s1470_s5 }
  0x26   :  { %p1477_p4 = por %p1476_p3, %p1475_p2 }
  0x28   :  { %p1478_p5 = pnand %p1477_p4, %p1471_p1 }
  0x2a   :  { %1481 = shalt.err (!%p1478_p5)
}
  0x2b   :  { %55 = dma.hbm_to_vmem [thread:$0]  %s1850_s3, 1024, %s50_s24, [#allocation6], %s1532_s14, %s1532_s14, %s1533_s15  }
  0x2c   :  { %s1536_s29 = smov [#allocation10]  }
  0x2d   :  { %s77_s30 = sshll.u32 %s1536_s29, 4  ;;  %s78_s30 = int_to_ptr.vmem [resolvable:$true] %s77_s30 }
  0x2e   :  { %s1490_s10 = scalar_lea.vmem %s78_s30, 1024  ;;  %p1495_p7 = scmp.lt.s32.totalorder %s78_s30, %s78_s30 }
  0x2f   :  { %p1491_p6 = scmp.ne.s32.totalorder %s78_s30, %s1490_s10  ;;  %p1496_p8 = scmp.lt.s32.totalorder %s1490_s10, %s1490_s10 }
  0x31   :  { %p1497_p9 = por %p1496_p8, %p1495_p7 }
  0x33   :  { %p1498_p10 = pnand %p1497_p9, %p1491_p6 }
  0x35   :  { %1501 = shalt.err (!%p1498_p10)
}
  0x36   :  { %83 = dma.hbm_to_vmem [thread:$0]  %s1854_s7, 1024, %s78_s30, [#allocation9], %s1532_s14, %s1532_s14, %s1533_s15  }
  0x37   :  { %1522 = dma.done.wait [#allocation3], 1024  }
  0x38   :  { %1523 = vsyncadd [#allocation3], 4294966272 }
  0x39   :  { %1524 = dma.done.wait [#allocation6], 2048  }
  0x3a   :  { %1525 = vsyncadd [#allocation6], 4294965248 }
  0x3b   :  { %1526 = dma.done.wait [#allocation9], 2048  }
  0x3c   :  { %1527 = vsyncadd [#allocation9], 4294965248  ;;  %v1328_v0 = vld [vmem:[#allocation5 + $0x38] sm:$0xff]   ;;  %v1329_v1 = vld [vmem:[#allocation5 + $0x30] sm:$0xff]   ;;  %vm1538_vm0 = vmmov 0   ;;  %vm973_vm1 = vcmask 1041409  }
  0x3d   :  { %1202 = vmatprep.subr.bf16.mxu0 %v1328_v0  ;;  %v1330_v2 = vld [vmem:[#allocation5 + $0x28] sm:$0xff]   ;;  %v1331_v3 = vld [vmem:[#allocation5 + $0x20] sm:$0xff]   ;;  %v1332_v5 = vld [vmem:[#allocation5 + $0x18] sm:$0xff]   ;;  %vm975_vm2 = vcmask 1042434   ;;  %vm977_vm3 = vcmask 1043459   ;;  %vm979_vm4 = vcmask 1044484  }
  0x3e   :  { %1203 = vmatpush3.bf16.msra.mxu0 %v1328_v0  ;;  %v1336_v4 = vld [vmem:[#allocation2] sm:$0xff]   ;;  %v1333_v6 = vld [vmem:[#allocation5 + $0x10] sm:$0xff]   ;;  %v1344_v7 = vld [vmem:[#allocation7 + $0x38] sm:$0xff]   ;;  %vm981_vm5 = vcmask 1045509   ;;  %vm983_vm6 = vcmask 1046534   ;;  %vm985_vm7 = vcmask 1047559  }
  0x3f   :  { %1204 = vmatprep.subr.bf16.mxu0 %v1329_v1  ;;  %1218 = vmatprep.mubr.bf16.mxu0 %v1336_v4  ;;  %v1345_v8 = vld [vmem:[#allocation7 + $0x30] sm:$0xff]   ;;  %v1334_v9 = vld [vmem:[#allocation5 + $0x8] sm:$0xff]   ;;  %v1335_v11 = vld [vmem:[#allocation5] sm:$0xff]   ;;  %s1539_s15 = smov [#allocation11]  }
  0x40   :  { %1234 = vmatprep.subr.bf16.mxu1 %v1344_v7  ;;  %v1346_v10 = vld [vmem:[#allocation7 + $0x28] sm:$0xff]   ;;  %v1347_v12 = vld [vmem:[#allocation7 + $0x20] sm:$0xff]   ;;  %v1348_v13 = vld [vmem:[#allocation7 + $0x18] sm:$0xff]   ;;  %s1090_s16 = sshll.u32 %s1539_s15, 4  ;;  %s1091_s16 = int_to_ptr.vmem [resolvable:$true] %s1090_s16 }
  0x41   :  { %1235 = vmatpush3.bf16.msra.mxu1 %v1344_v7  ;;  %v1337_v14 = vld [vmem:[#allocation2 + $0x8] sm:$0xff]   ;;  %v1338_v15 = vld [vmem:[#allocation2 + $0x10] sm:$0xff]   ;;  %v1339_v16 = vld [vmem:[#allocation2 + $0x18] sm:$0xff]   ;;  %s1502_s17 = scalar_lea.vmem %s1091_s16, 128  ;;  %p1507_p12 = scmp.lt.s32.totalorder %s1091_s16, %s1091_s16 }
  0x42   :  { %1205 = vmatpush3.bf16.msra.mxu0 %v1329_v1  ;;  %1236 = vmatprep.subr.bf16.mxu1 %v1345_v8  ;;  %v1340_v17 = vld [vmem:[#allocation2 + $0x20] sm:$0xff]   ;;  %v1341_v18 = vld [vmem:[#allocation2 + $0x28] sm:$0xff]   ;;  %v1342_v19 = vld [vmem:[#allocation2 + $0x30] sm:$0xff]   ;;  %p1503_p11 = scmp.ne.s32.totalorder %s1091_s16, %s1502_s17  ;;  %p1508_p13 = scmp.lt.s32.totalorder %s1502_s17, %s1502_s17 }
  0x43   :  { %1206 = vmatprep.subr.bf16.mxu0 %v1330_v2  ;;  %v1343_v20 = vld [vmem:[#allocation2 + $0x38] sm:$0xff]   ;;  %v1349_v21 = vld [vmem:[#allocation7 + $0x10] sm:$0xff]   ;;  %v1350_v22 = vld [vmem:[#allocation7 + $0x8] sm:$0xff]  }
  0x44   :  { %v1351_v23 = vld [vmem:[#allocation7] sm:$0xff]   ;;  %v1352_v1 = vld [vmem:[#allocation8 + $0x38] sm:$0xff]   ;;  %v1358_v7 = vld [vmem:[#allocation8 + $0x8] sm:$0xff]   ;;  %p1509_p0 = por %p1508_p13, %p1507_p12 }
  0x45   :  { %1237 = vmatpush3.bf16.msra.mxu1 %v1345_v8  ;;  %v1101_v27 = vld [vmem:[%s1849_s2] ss:$0 sm:$0xff] }
  0x46   :  { %1207 = vmatpush3.bf16.msra.mxu0 %v1330_v2  ;;  %1238 = vmatprep.subr.bf16.mxu1 %v1346_v10  ;;  %v1353_v2 = vld [vmem:[#allocation8 + $0x30] sm:$0xff]   ;;  %v1355_v4 = vld [vmem:[#allocation8 + $0x20] sm:$0xff]   ;;  %p1510_p1 = pnand %p1509_p0, %p1503_p11 }
  0x47   :  { %1208 = vmatprep.subr.bf16.mxu0 %v1331_v3  ;;  %v1359_v8 = vld [vmem:[#allocation8] sm:$0xff]  }
  0x49   :  { %1239 = vmatpush3.bf16.msra.mxu1 %v1346_v10 }
  0x4a   :  { %1209 = vmatpush3.bf16.msra.mxu0 %v1331_v3  ;;  %1240 = vmatprep.subr.bf16.mxu1 %v1347_v12  ;;  %v1354_v3 = vld [vmem:[#allocation8 + $0x28] sm:$0xff]  }
  0x4b   :  { %1210 = vmatprep.subr.bf16.mxu0 %v1332_v5 }
  0x4d   :  { %1241 = vmatpush3.bf16.msra.mxu1 %v1347_v12 }
  0x4e   :  { %1211 = vmatpush3.bf16.msra.mxu0 %v1332_v5  ;;  %1242 = vmatprep.subr.bf16.mxu1 %v1348_v13  ;;  %v1356_v5 = vld [vmem:[#allocation8 + $0x18] sm:$0xff]  }
  0x4f   :  { %1212 = vmatprep.subr.bf16.mxu0 %v1333_v6 }
  0x51   :  { %1243 = vmatpush3.bf16.msra.mxu1 %v1348_v13 }
  0x52   :  { %1213 = vmatpush3.bf16.msra.mxu0 %v1333_v6  ;;  %1244 = vmatprep.subr.bf16.mxu1 %v1349_v21  ;;  %v1357_v6 = vld [vmem:[#allocation8 + $0x10] sm:$0xff]  }
  0x53   :  { %1214 = vmatprep.subr.bf16.mxu0 %v1334_v9 }
  0x55   :  { %1245 = vmatpush3.bf16.msra.mxu1 %v1349_v21 }
  0x56   :  { %1215 = vmatpush3.bf16.msra.mxu0 %v1334_v9  ;;  %1246 = vmatprep.subr.bf16.mxu1 %v1350_v22  ;;  %v1674_v9 = vld [vmem:[%s1851_s4] ss:$0 sm:$0xff] }
  0x57   :  { %1216 = vmatprep.subr.bf16.mxu0 %v1335_v11 }
  0x59   :  { %1247 = vmatpush3.bf16.msra.mxu1 %v1350_v22 }
  0x5a   :  { %1217 = vmatpush3.bf16.msra.mxu0 %v1335_v11  ;;  %1248 = vmatprep.subr.bf16.mxu1 %v1351_v23 }
  0x5b   :  { %1266 = vmatprep.subr.bf16.mxu0 %v1352_v1 }
  0x5d   :  { %1219 = vmatmul.mubr.bf16.vlgmr.msra.gmra.mxu0 %v1337_v14  ;;  %1249 = vmatpush3.bf16.msra.mxu1 %v1351_v23 }
  0x5e   :  { %1222 = vmatprep.mubr.bf16.mxu0 %v1338_v15  ;;  %1267 = vmatpush3.bf16.msra.mxu0 %v1352_v1 }
  0x5f   :  { %1268 = vmatprep.subr.bf16.mxu0 %v1353_v2 }
  0x62   :  { %1269 = vmatpush3.bf16.msra.mxu0 %v1353_v2 }
  0x63   :  { %1270 = vmatprep.subr.bf16.mxu0 %v1354_v3 }
  0x65   :  { %1223 = vmatmul.mubr.bf16.gmra.mxu0 %v1339_v16 }
  0x66   :  { %1226 = vmatprep.mubr.bf16.mxu0 %v1340_v17  ;;  %1271 = vmatpush3.bf16.msra.mxu0 %v1354_v3 }
  0x67   :  { %1272 = vmatprep.subr.bf16.mxu0 %v1355_v4 }
  0x6a   :  { %1273 = vmatpush3.bf16.msra.mxu0 %v1355_v4 }
  0x6b   :  { %1274 = vmatprep.subr.bf16.mxu0 %v1356_v5 }
  0x6d   :  { %1227 = vmatmul.mubr.bf16.gmra.mxu0 %v1341_v18 }
  0x6e   :  { %1230 = vmatprep.mubr.bf16.mxu0 %v1342_v19  ;;  %1275 = vmatpush3.bf16.msra.mxu0 %v1356_v5 }
  0x6f   :  { %1276 = vmatprep.subr.bf16.mxu0 %v1357_v6 }
  0x72   :  { %1277 = vmatpush3.bf16.msra.mxu0 %v1357_v6 }
  0x73   :  { %1278 = vmatprep.subr.bf16.mxu0 %v1358_v7 }
  0x75   :  { %1231 = vmatmul.mubr.bf16.gmra.mxu0 %v1343_v20 }
  0x76   :  { %1279 = vmatpush3.bf16.msra.mxu0 %v1358_v7 }
  0x77   :  { %1280 = vmatprep.subr.bf16.mxu0 %v1359_v8 }
  0x7a   :  { %1281 = vmatpush3.bf16.msra.mxu0 %v1359_v8 }
 0x11d   :  { %v1220_v24 = vpop.f32.mrf.mxu0 }
 0x11e   :  { %v1629_v32 = vadd.f32 %v1220_v24, %v1101_v27 }
 0x11f   :  { %v271_v25 = vpop.f32.mrf.mxu0 }
 0x120   :  { %v1625_v30 = vadd.f32 %v1101_v27, %v271_v25 }
 0x121   :  { %v1221_v26 = vpop.f32.mrf.mxu0 }
 0x122   :  { %v1623_v28 = vadd.f32 %v1221_v26, %v1101_v27 }
 0x123   :  { %v274_v29 = vpop.f32.mrf.mxu0 }
 0x124   :  { %v1627_v31 = vadd.f32 %v1101_v27, %v274_v29  ;;  %v335_v35 = vpack.c.bf16 %v1623_v28, %v1629_v32 }
 0x125   :  { %v1224_v33 = vpop.f32.mrf.mxu0 }
 0x126   :  { %v334_v34 = vpack.c.bf16 %v1627_v31, %v1625_v30  ;;  %v1641_v42 = vadd.f32 %v1224_v33, %v1101_v27 }
 0x127   :  { %v287_v36 = vpop.f32.mrf.mxu0 }
 0x128   :  { %1250 = vmatprep.mubr.bf16.mxu1 %v334_v34  ;;  %v1637_v40 = vadd.f32 %v1101_v27, %v287_v36 }
 0x129   :  { %v1225_v37 = vpop.f32.mrf.mxu0  ;;  %1251 = vmatmul.mubr.bf16.vlgmr.msra.gmra.mxu1 %v335_v35 }
 0x12a   :  { %v1635_v38 = vadd.f32 %v1225_v37, %v1101_v27 }
 0x12b   :  { %v290_v39 = vpop.f32.mrf.mxu0 }
 0x12c   :  { %v1639_v41 = vadd.f32 %v1101_v27, %v290_v39  ;;  %v337_v45 = vpack.c.bf16 %v1635_v38, %v1641_v42 }
 0x12d   :  { %v1228_v43 = vpop.f32.mrf.mxu0 }
 0x12e   :  { %v336_v44 = vpack.c.bf16 %v1639_v41, %v1637_v40  ;;  %v1653_v52 = vadd.f32 %v1228_v43, %v1101_v27 }
 0x12f   :  { %v303_v46 = vpop.f32.mrf.mxu0 }
 0x130   :  { %1254 = vmatprep.mubr.bf16.mxu1 %v336_v44  ;;  %v1649_v50 = vadd.f32 %v1101_v27, %v303_v46 }
 0x131   :  { %v1229_v47 = vpop.f32.mrf.mxu0  ;;  %1255 = vmatmul.mubr.bf16.gmra.mxu1 %v337_v45 }
 0x132   :  { %v1647_v48 = vadd.f32 %v1229_v47, %v1101_v27 }
 0x133   :  { %v306_v49 = vpop.f32.mrf.mxu0 }
 0x134   :  { %v1651_v51 = vadd.f32 %v1101_v27, %v306_v49  ;;  %v339_v55 = vpack.c.bf16 %v1647_v48, %v1653_v52 }
 0x135   :  { %v1232_v53 = vpop.f32.mrf.mxu0 }
 0x136   :  { %v338_v54 = vpack.c.bf16 %v1651_v51, %v1649_v50  ;;  %v1665_v62 = vadd.f32 %v1232_v53, %v1101_v27 }
 0x137   :  { %v319_v56 = vpop.f32.mrf.mxu0 }
 0x138   :  { %1258 = vmatprep.mubr.bf16.mxu1 %v338_v54  ;;  %v1661_v60 = vadd.f32 %v1101_v27, %v319_v56 }
 0x139   :  { %v1233_v57 = vpop.f32.mrf.mxu0  ;;  %1259 = vmatmul.mubr.bf16.gmra.mxu1 %v339_v55 }
 0x13a   :  { %v1659_v58 = vadd.f32 %v1233_v57, %v1101_v27 }
 0x13b   :  { %v322_v59 = vpop.f32.mrf.mxu0 }
 0x13c   :  { %v1663_v61 = vadd.f32 %v1101_v27, %v322_v59  ;;  %v341_v0 = vpack.c.bf16 %v1659_v58, %v1665_v62 }
 0x13e   :  { %v340_v63 = vpack.c.bf16 %v1663_v61, %v1661_v60 }
 0x140   :  { %1262 = vmatprep.mubr.bf16.mxu1 %v340_v63 }
 0x141   :  { %1263 = vmatmul.mubr.bf16.gmra.mxu1 %v341_v0 }
 0x1e9   :  { %v1252_v10 = vpop.f32.mrf.mxu1 }
 0x1ea   :  { %v1677_v11 = vadd.f32 %v1252_v10, %v1674_v9 }
 0x1eb   :  { %v470_v12 = vpop.f32.mrf.mxu1 }
 0x1ec   :  { %v535_v13 = vmul.f32 %v1677_v11, %v1677_v11  ;;  %v1682_v14 = vadd.f32 %v1674_v9, %v470_v12 }
 0x1ed   :  { %v1253_v15 = vpop.f32.mrf.mxu1 }
 0x1ee   :  { %v551_v16 = vmul.f32 %v535_v13, %v1677_v11  ;;  %v533_v17 = vmul.f32 %v1682_v14, %v1682_v14  ;;  %v1688_v18 = vadd.f32 %v1253_v15, %v1674_v9 }
 0x1ef   :  { %v473_v19 = vpop.f32.mrf.mxu1 }
 0x1f0   :  { %v567_v20 = vmul.f32 0.044715, %v551_v16  ;;  %v549_v21 = vmul.f32 %v533_v17, %v1682_v14  ;;  %v536_v22 = vmul.f32 %v1688_v18, %v1688_v18  ;;  %v1694_v23 = vadd.f32 %v1674_v9, %v473_v19 }
 0x1f1   :  { %v1256_v24 = vpop.f32.mrf.mxu1 }
 0x1f2   :  { %v583_v25 = vadd.f32 %v567_v20, %v1677_v11  ;;  %v565_v26 = vmul.f32 0.044715, %v549_v21  ;;  %v552_v27 = vmul.f32 %v536_v22, %v1688_v18  ;;  %v534_v29 = vmul.f32 %v1694_v23, %v1694_v23 }
 0x1f3   :  { %v1701_v33 = vadd.f32 %v1256_v24, %v1674_v9  ;;  %v486_v34 = vpop.f32.mrf.mxu1 }
 0x1f4   :  { %v599_v35 = vmul.f32 0.7978846, %v583_v25  ;;  %v581_v36 = vadd.f32 %v565_v26, %v1682_v14  ;;  %v568_v37 = vmul.f32 0.044715, %v552_v27  ;;  %v550_v39 = vmul.f32 %v534_v29, %v1694_v23 }
 0x1f5   :  { %v539_v43 = vmul.f32 %v1701_v33, %v1701_v33  ;;  %v1708_v44 = vadd.f32 %v1674_v9, %v486_v34  ;;  %v1257_v45 = vpop.f32.mrf.mxu1 }
 0x1f6   :  { %1368 = vtanh.f32 %v599_v35  ;;  %v597_v46 = vmul.f32 0.7978846, %v581_v36  ;;  %v584_v47 = vadd.f32 %v568_v37, %v1688_v18  ;;  %v566_v49 = vmul.f32 0.044715, %v550_v39 }
 0x1f7   :  { %v555_v53 = vmul.f32 %v539_v43, %v1701_v33  ;;  %v537_v54 = vmul.f32 %v1708_v44, %v1708_v44  ;;  %v1715_v55 = vadd.f32 %v1257_v45, %v1674_v9  ;;  %v489_v56 = vpop.f32.mrf.mxu1 }
 0x1f8   :  { %v600_v57 = vmul.f32 0.7978846, %v584_v47  ;;  %v582_v59 = vadd.f32 %v566_v49, %v1694_v23  ;;  %v1719_v63 = vadd.f32 %v1674_v9, %v489_v56  ;;  %1370 = vtanh.f32 %v597_v46 }
 0x1f9   :  { %v571_v0 = vmul.f32 0.044715, %v555_v53  ;;  %v553_v1 = vmul.f32 %v537_v54, %v1708_v44  ;;  %v540_v2 = vmul.f32 %v1715_v55, %v1715_v55  ;;  %v1260_v3 = vpop.f32.mrf.mxu1 }
 0x1fa   :  { %1372 = vtanh.f32 %v600_v57  ;;  %v598_v4 = vmul.f32 0.7978846, %v582_v59  ;;  %v538_v5 = vmul.f32 %v1719_v63, %v1719_v63  ;;  %v1727_v6 = vadd.f32 %v1260_v3, %v1674_v9 }
 0x1fb   :  { %v587_v7 = vadd.f32 %v571_v0, %v1701_v33  ;;  %v569_v8 = vmul.f32 0.044715, %v553_v1  ;;  %v556_v10 = vmul.f32 %v540_v2, %v1715_v55  ;;  %v502_v12 = vpop.f32.mrf.mxu1 }
 0x1fc   :  { %1374 = vtanh.f32 %v598_v4  ;;  %v554_v13 = vmul.f32 %v538_v5, %v1719_v63  ;;  %v543_v15 = vmul.f32 %v1727_v6, %v1727_v6  ;;  %v1735_v16 = vadd.f32 %v1674_v9, %v502_v12 }
 0x1fd   :  { %v603_v17 = vmul.f32 0.7978846, %v587_v7  ;;  %v585_v19 = vadd.f32 %v569_v8, %v1708_v44  ;;  %v572_v20 = vmul.f32 0.044715, %v556_v10  ;;  %v1261_v21 = vpop.f32.mrf.mxu1 }
 0x1fe   :  { %v570_v22 = vmul.f32 0.044715, %v554_v13  ;;  %v559_v24 = vmul.f32 %v543_v15, %v1727_v6  ;;  %v541_v25 = vmul.f32 %v1735_v16, %v1735_v16  ;;  %v1742_v26 = vadd.f32 %v1261_v21, %v1674_v9 }
 0x1ff   :  { %1376 = vtanh.f32 %v603_v17  ;;  %v601_v27 = vmul.f32 0.7978846, %v585_v19  ;;  %v588_v29 = vadd.f32 %v572_v20, %v1715_v55  ;;  %v505_v34 = vpop.f32.mrf.mxu1 }
 0x200   :  { %v586_v35 = vadd.f32 %v570_v22, %v1719_v63  ;;  %v575_v36 = vmul.f32 0.044715, %v559_v24  ;;  %v557_v37 = vmul.f32 %v541_v25, %v1735_v16  ;;  %v544_v39 = vmul.f32 %v1742_v26, %v1742_v26 }
 0x201   :  { %1378 = vtanh.f32 %v601_v27  ;;  %v604_v43 = vmul.f32 0.7978846, %v588_v29  ;;  %v1750_v45 = vadd.f32 %v1674_v9, %v505_v34  ;;  %v1264_v46 = vpop.f32.mrf.mxu1 }
 0x202   :  { %v602_v47 = vmul.f32 0.7978846, %v586_v35  ;;  %v591_v49 = vadd.f32 %v575_v36, %v1727_v6  ;;  %v573_v53 = vmul.f32 0.044715, %v557_v37  ;;  %v560_v54 = vmul.f32 %v544_v39, %v1742_v26 }
 0x203   :  { %v1369_v56 = vpop.eup %1368  ;;  %1380 = vtanh.f32 %v604_v43  ;;  %v542_v57 = vmul.f32 %v1750_v45, %v1750_v45  ;;  %v1757_v59 = vadd.f32 %v1264_v46, %v1674_v9  ;;  %v518_v0 = vpop.f32.mrf.mxu1 }
 0x204   :  { %v631_v1 = vadd.f32 1.0, %v1369_v56  ;;  %1382 = vtanh.f32 %v602_v47  ;;  %v607_v2 = vmul.f32 0.7978846, %v591_v49  ;;  %v589_v3 = vadd.f32 %v573_v53, %v1735_v16 }
 0x205   :  { %v576_v4 = vmul.f32 0.044715, %v560_v54  ;;  %v558_v5 = vmul.f32 %v542_v57, %v1750_v45  ;;  %v547_v7 = vmul.f32 %v1757_v59, %v1757_v59  ;;  %v1764_v8 = vadd.f32 %v1674_v9, %v518_v0  ;;  %v1265_v10 = vpop.f32.mrf.mxu1  ;;  %v1371_v12 = vpop.eup %1370 }
 0x206   :  { %1384 = vtanh.f32 %v607_v2  ;;  %v605_v13 = vmul.f32 0.7978846, %v589_v3  ;;  %v1767_v15 = vadd.f32 %v1265_v10, %v1674_v9  ;;  %v647_v25 = vmul.f32 0.5, %v631_v1 }
 0x207   :  { %v1373_v17 = vpop.eup %1372  ;;  %v592_v19 = vadd.f32 %v576_v4, %v1742_v26  ;;  %v574_v20 = vmul.f32 0.044715, %v558_v5  ;;  %v563_v21 = vmul.f32 %v547_v7, %v1757_v59  ;;  %v545_v22 = vmul.f32 %v1764_v8, %v1764_v8  ;;  %v521_v24 = vpop.f32.mrf.mxu1 }
 0x208   :  { %v632_v27 = vadd.f32 1.0, %v1373_v17  ;;  %1386 = vtanh.f32 %v605_v13  ;;  %v548_v29 = vmul.f32 %v1767_v15, %v1767_v15  ;;  %v1779_v47 = vadd.f32 %v1674_v9, %v521_v24 }
 0x209   :  { %v1375_v34 = vpop.eup %1374  ;;  %v608_v35 = vmul.f32 0.7978846, %v592_v19  ;;  %v590_v36 = vadd.f32 %v574_v20, %v1750_v45  ;;  %v579_v37 = vmul.f32 0.044715, %v563_v21  ;;  %v561_v39 = vmul.f32 %v545_v22, %v1764_v8 }
 0x20a   :  { %v648_v43 = vmul.f32 0.5, %v632_v27  ;;  %v564_v46 = vmul.f32 %v548_v29, %v1767_v15  ;;  %v629_v49 = vadd.f32 1.0, %v1371_v12  ;;  %v546_v1 = vmul.f32 %v1779_v47, %v1779_v47 }
 0x20b   :  { %1388 = vtanh.f32 %v608_v35  ;;  %v606_v53 = vmul.f32 0.7978846, %v590_v36  ;;  %v595_v54 = vadd.f32 %v579_v37, %v1757_v59  ;;  %v577_v56 = vmul.f32 0.044715, %v561_v39 }
 0x20c   :  { %v1377_v57 = vpop.eup %1376  ;;  %v580_v0 = vmul.f32 0.044715, %v564_v46  ;;  %v630_v2 = vadd.f32 1.0, %v1375_v34  ;;  %v645_v5 = vmul.f32 0.5, %v629_v49  ;;  %v663_v9 = vmul.f32 %v647_v25, %v1677_v11 }
 0x20d   :  { %1390 = vtanh.f32 %v606_v53  ;;  %v611_v3 = vmul.f32 0.7978846, %v595_v54  ;;  %v593_v4 = vadd.f32 %v577_v56, %v1764_v8  ;;  %v562_v12 = vmul.f32 %v546_v1, %v1779_v47 }
 0x20e   :  { %v1379_v7 = vpop.eup %1378  ;;  %v596_v10 = vadd.f32 %v580_v0, %v1767_v15  ;;  %v646_v13 = vmul.f32 0.5, %v630_v2  ;;  %v664_v17 = vmul.f32 %v648_v43, %v1688_v18  ;;  %v661_v27 = vmul.f32 %v645_v5, %v1682_v14 }
 0x20f   :  { %1392 = vtanh.f32 %v611_v3  ;;  %v609_v19 = vmul.f32 0.7978846, %v593_v4  ;;  %v633_v20 = vadd.f32 1.0, %v1379_v7  ;;  %v578_v24 = vmul.f32 0.044715, %v562_v12 }
 0x210   :  { %v1381_v21 = vpop.eup %1380  ;;  %v612_v22 = vmul.f32 0.7978846, %v596_v10  ;;  %v662_v29 = vmul.f32 %v646_v13, %v1694_v23  ;;  %v635_v25 = vadd.f32 1.0, %v1377_v57  ;;  %v678_v43 = vpack.c.bf16 %v664_v17, %v663_v9 }
 0x211   :  { %v1383_v34 = vpop.eup %1382  ;;  %1394 = vtanh.f32 %v609_v19  ;;  %v649_v11 = vmul.f32 0.5, %v633_v20  ;;  %v636_v35 = vadd.f32 1.0, %v1381_v21  ;;  %v594_v36 = vadd.f32 %v578_v24, %v1779_v47 }
 0x212   :  { %1396 = vtanh.f32 %v612_v22  ;;  %v677_v37 = vpack.c.bf16 %v662_v29, %v661_v27  ;;  %v634_v18 = vadd.f32 1.0, %v1383_v34  ;;  %v651_v14 = vmul.f32 0.5, %v635_v25 }
 0x213   :  { %v1385_v39 = vpop.eup %1384  ;;  %v652_v46 = vmul.f32 0.5, %v636_v35  ;;  %v610_v49 = vmul.f32 0.7978846, %v594_v36  ;;  %v665_v23 = vmul.f32 %v649_v11, %v1708_v44 }
 0x214   :  { %1282 = vmatprep.mubr.bf16.mxu0 %v677_v37  ;;  %v650_v53 = vmul.f32 0.5, %v634_v18  ;;  %v667_v3 = vmul.f32 %v651_v14, %v1701_v33  ;;  %v639_v4 = vadd.f32 1.0, %v1385_v39  ;;  %v1362_v14 = vld [vmem:[#allocation10 + $0x28] sm:$0xff]  }
 0x215   :  { %v1387_v54 = vpop.eup %1386  ;;  %1283 = vmatmul.mubr.bf16.vlgmr.msra.gmra.mxu0 %v678_v43  ;;  %1398 = vtanh.f32 %v610_v49  ;;  %v668_v57 = vmul.f32 %v652_v46, %v1715_v55  ;;  %v1360_v49 = vld [vmem:[#allocation10 + $0x38] sm:$0xff]  }
 0x216   :  { %v666_v56 = vmul.f32 %v650_v53, %v1719_v63  ;;  %v637_v0 = vadd.f32 1.0, %v1387_v54  ;;  %v655_v19 = vmul.f32 0.5, %v639_v4  ;;  %v1537_v53 = vmov 0.0   ;;  %v1361_v54 = vld [vmem:[#allocation10 + $0x30] sm:$0xff]  }
 0x217   :  { %v680_v9 = vpack.c.bf16 %v668_v57, %v667_v3  ;;  %1298 = vmatprep.subr.bf16.mxu1 %v1537_v53  ;;  %1314 = vmatprep.mubr.msk.bf16.mxu1 %vm1538_vm0, %v1537_v53 }
 0x218   :  { %v1389_v1 = vpop.eup %1388  ;;  %v679_v2 = vpack.c.bf16 %v666_v56, %v665_v23  ;;  %v653_v12 = vmul.f32 0.5, %v637_v0  ;;  %v671_v29 = vmul.f32 %v655_v19, %v1727_v6  ;;  %1299 = vmatpush3.bf16.msra.mxu1 %v1360_v49  ;;  %v1367_v23 = vld [vmem:[#allocation10] sm:$0xff]  }
 0x219   :  { %v640_v5 = vadd.f32 1.0, %v1389_v1  ;;  %1300 = vmatprep.subr.bf16.mxu1 %v1537_v53  ;;  %v1807_v56 = vld [vmem:[%s1853_s6] ss:$0 sm:$0xff] }
 0x21a   :  { %v1391_v7 = vpop.eup %1390  ;;  %1286 = vmatprep.mubr.bf16.mxu0 %v679_v2  ;;  %v669_v55 = vmul.f32 %v653_v12, %v1735_v16  ;;  %v351_v1 = vadd.f32 %v1807_v56, %v1629_v32  ;;  %v352_v2 = vadd.f32 %v1807_v56, %v1623_v28  ;;  %v355_v28 = vadd.f32 %v1807_v56, %v1641_v42 }
 0x21b   :  { %v638_v10 = vadd.f32 1.0, %v1391_v7  ;;  %v656_v13 = vmul.f32 0.5, %v640_v5  ;;  %v349_v5 = vadd.f32 %v1807_v56, %v1625_v30  ;;  %v356_v30 = vadd.f32 %v1807_v56, %v1635_v38 }
 0x21c   :  { %v1393_v17 = vpop.eup %1392  ;;  %1301 = vmatpush3.bf16.msra.mxu1 %v1361_v54 }
 0x21d   :  { %1287 = vmatmul.mubr.bf16.gmra.mxu0 %v680_v9  ;;  %v654_v44 = vmul.f32 0.5, %v638_v10  ;;  %v672_v33 = vmul.f32 %v656_v13, %v1742_v26  ;;  %v643_v34 = vadd.f32 1.0, %v1393_v17  ;;  %1302 = vmatprep.subr.bf16.mxu1 %v1537_v53  ;;  %v350_v9 = vadd.f32 %v1807_v56, %v1627_v31 }
 0x21e   :  { %v1395_v63 = vpop.eup %1394 }
 0x21f   :  { %v1397_v20 = vpop.eup %1396  ;;  %v670_v21 = vmul.f32 %v654_v44, %v1750_v45  ;;  %v641_v22 = vadd.f32 1.0, %v1395_v63  ;;  %v682_v25 = vpack.c.bf16 %v672_v33, %v671_v29  ;;  %v659_v18 = vmul.f32 0.5, %v643_v34 }
 0x220   :  { %v644_v24 = vadd.f32 1.0, %v1397_v20  ;;  %1303 = vmatpush3.bf16.msra.mxu1 %v1362_v14  ;;  %v354_v33 = vadd.f32 %v1807_v56, %v1639_v41 }
 0x221   :  { %v681_v27 = vpack.c.bf16 %v670_v21, %v669_v55  ;;  %v657_v37 = vmul.f32 0.5, %v641_v22  ;;  %v675_v43 = vmul.f32 %v659_v18, %v1757_v59  ;;  %1304 = vmatprep.subr.bf16.mxu1 %v1537_v53  ;;  %v1365_v59 = vld [vmem:[#allocation10 + $0x10] sm:$0xff]   ;;  %v353_v21 = vadd.f32 %v1807_v56, %v1637_v40 }
 0x222   :  { %v1399_v11 = vpop.eup %1398  ;;  %v660_v35 = vmul.f32 0.5, %v644_v24 }
 0x223   :  { %1290 = vmatprep.mubr.bf16.mxu0 %v681_v27  ;;  %v642_v36 = vadd.f32 1.0, %v1399_v11  ;;  %v673_v45 = vmul.f32 %v657_v37, %v1764_v8  ;;  %v1363_v8 = vld [vmem:[#allocation10 + $0x20] sm:$0xff]  }
 0x224   :  { %v676_v16 = vmul.f32 %v660_v35, %v1767_v15  ;;  %1305 = vmatpush3.bf16.msra.mxu1 %v1363_v8  ;;  %v1364_v15 = vld [vmem:[#allocation10 + $0x18] sm:$0xff]  }
 0x225   :  { %1291 = vmatmul.mubr.bf16.gmra.mxu0 %v682_v25  ;;  %v658_v39 = vmul.f32 0.5, %v642_v36  ;;  %1306 = vmatprep.subr.bf16.mxu1 %v1537_v53 }
 0x226   :  { %v684_v6 = vpack.c.bf16 %v676_v16, %v675_v43 }
 0x227   :  { %v674_v26 = vmul.f32 %v658_v39, %v1779_v47  ;;  %v1366_v47 = vld [vmem:[#allocation10 + $0x8] sm:$0xff]  }
 0x228   :  { %1307 = vmatpush3.bf16.msra.mxu1 %v1364_v15 }
 0x229   :  { %v683_v46 = vpack.c.bf16 %v674_v26, %v673_v45  ;;  %1308 = vmatprep.subr.bf16.mxu1 %v1537_v53 }
 0x22b   :  { %1294 = vmatprep.mubr.bf16.mxu0 %v683_v46  ;;  %v359_v46 = vadd.f32 %v1807_v56, %v1653_v52 }
 0x22c   :  { %1309 = vmatpush3.bf16.msra.mxu1 %v1365_v59  ;;  %v357_v59 = vadd.f32 %v1807_v56, %v1649_v50  ;;  %v361_v50 = vadd.f32 %v1807_v56, %v1661_v60 }
 0x22d   :  { %1295 = vmatmul.mubr.bf16.gmra.mxu0 %v684_v6  ;;  %1310 = vmatprep.subr.bf16.mxu1 %v1537_v53  ;;  %v360_v6 = vadd.f32 %v1807_v56, %v1647_v48 }
 0x230   :  { %1311 = vmatpush3.bf16.msra.mxu1 %v1366_v47 }
 0x231   :  { %1312 = vmatprep.subr.bf16.mxu1 %v1537_v53 }
 0x234   :  { %1313 = vmatpush3.bf16.msra.mxu1 %v1367_v23  ;;  %v358_v23 = vadd.f32 %v1807_v56, %v1651_v51 }
 0x2d5   :  { %v1284_v57 = vpop.f32.mrf.mxu0 }
 0x2d6   :  { %v848_v4 = vadd.f32 %v1284_v57, %v351_v1 }
 0x2d7   :  { %v783_v0 = vpop.f32.mrf.mxu0 }
 0x2d8   :  { %v846_v12 = vadd.f32 %v783_v0, %v349_v5  ;;  %v363_v5 = vadd.f32 %v1807_v56, %v1665_v62 }
 0x2d9   :  { %v1285_v3 = vpop.f32.mrf.mxu0 }
 0x2da   :  { %v849_v7 = vadd.f32 %v1285_v3, %v352_v2 }
 0x2db   :  { %v786_v10 = vpop.f32.mrf.mxu0 }
 0x2dc   :  { %v869_v13 = vadd.f32 %v849_v7, %v848_v4  ;;  %v847_v17 = vadd.f32 %v786_v10, %v350_v9 }
 0x2dd   :  { %v1288_v44 = vpop.f32.mrf.mxu0 }
 0x2de   :  { %v870_v19 = vrot.slane %v869_v13, 4  ;;  %v862_v63 = vadd.f32 %v847_v17, %v846_v12  ;;  %v852_v27 = vadd.f32 %v1288_v44, %v355_v28  ;;  %v364_v44 = vadd.f32 %v1807_v56, %v1659_v58 }
 0x2df   :  { %v799_v32 = vpop.f32.mrf.mxu0 }
 0x2e0   :  { %v871_v20 = vadd.f32 %v870_v19, %v869_v13  ;;  %v863_v55 = vrot.slane %v862_v63, 4  ;;  %v850_v34 = vadd.f32 %v799_v32, %v353_v21  ;;  %v362_v21 = vadd.f32 %v1807_v56, %v1663_v61 }
 0x2e1   :  { %v1289_v31 = vpop.f32.mrf.mxu0 }
 0x2e2   :  { %v872_v22 = vrot.slane %v871_v20, 2  ;;  %v864_v24 = vadd.f32 %v863_v55, %v862_v63  ;;  %v853_v29 = vadd.f32 %v1289_v31, %v356_v30 }
 0x2e3   :  { %v802_v11 = vpop.f32.mrf.mxu0 }
 0x2e4   :  { %v873_v25 = vadd.f32 %v872_v22, %v871_v20  ;;  %v865_v35 = vrot.slane %v864_v24, 2  ;;  %v883_v36 = vadd.f32 %v853_v29, %v852_v27  ;;  %v851_v42 = vadd.f32 %v802_v11, %v354_v33 }
 0x2e5   :  { %v1292_v37 = vpop.f32.mrf.mxu0 }
 0x2e6   :  { %v874_v18 = vrot.slane %v873_v25, 1  ;;  %v866_v38 = vadd.f32 %v865_v35, %v864_v24  ;;  %v884_v39 = vrot.slane %v883_v36, 4  ;;  %v876_v16 = vadd.f32 %v851_v42, %v850_v34 }
 0x2e7   :  { %v815_v40 = vpop.f32.mrf.mxu0  ;;  %v856_v15 = vadd.f32 %v1292_v37, %v359_v46 }
 0x2e8   :  { %v875_v45 = vadd.f32 %v874_v18, %v873_v25  ;;  %v867_v26 = vrot.slane %v866_v38, 1  ;;  %v885_v43 = vadd.f32 %v884_v39, %v883_v36  ;;  %v877_v41 = vrot.slane %v876_v16, 4 }
 0x2e9   :  { %v1293_v49 = vpop.f32.mrf.mxu0  ;;  %v854_v3 = vadd.f32 %v815_v40, %v357_v59 }
 0x2ea   :  { %v919_v53 = vmul.f32 0.0625, %v875_v45  ;;  %v868_v54 = vadd.f32 %v867_v26, %v866_v38  ;;  %v886_v14 = vrot.slane %v885_v43, 2  ;;  %v878_v8 = vadd.f32 %v877_v41, %v876_v16 }
 0x2eb   :  { %v857_v47 = vadd.f32 %v1293_v49, %v360_v6  ;;  %v818_v57 = vpop.f32.mrf.mxu0 }
 0x2ec   :  { %v927_v0 = vpack.c.bf16 %v919_v53, %v919_v53  ;;  %v918_v1 = vmul.f32 0.0625, %v868_v54  ;;  %v887_v52 = vadd.f32 %v886_v14, %v885_v43  ;;  %v879_v2 = vrot.slane %v878_v8, 2 }
 0x2ed   :  { %v897_v48 = vadd.f32 %v857_v47, %v856_v15  ;;  %v855_v4 = vadd.f32 %v818_v57, %v358_v23  ;;  %v1296_v7 = vpop.f32.mrf.mxu0 }
 0x2ee   :  { %v926_v9 = vpack.c.bf16 %v918_v1, %v918_v1  ;;  %v888_v10 = vrot.slane %v887_v52, 1  ;;  %v880_v12 = vadd.f32 %v879_v2, %v878_v8  ;;  %v966_v19 = vunpack.c.l.b16 %v927_v0 }
 0x2ef   :  { %v898_v51 = vrot.slane %v897_v48, 4  ;;  %v890_v13 = vadd.f32 %v855_v4, %v854_v3  ;;  %v831_v17 = vpop.f32.mrf.mxu0  ;;  %v860_v28 = vadd.f32 %v1296_v7, %v363_v5 }
 0x2f0   :  { %v965_v63 = vunpack.c.l.b16 %v926_v9  ;;  %v889_v32 = vadd.f32 %v888_v10, %v887_v52  ;;  %v881_v20 = vrot.slane %v880_v12, 1  ;;  %v858_v58 = vadd.f32 %v831_v17, %v361_v50 }
 0x2f1   :  { %v899_v55 = vadd.f32 %v898_v51, %v897_v48  ;;  %v891_v62 = vrot.slane %v890_v13, 4  ;;  %v1297_v30 = vpop.f32.mrf.mxu0 }
 0x2f2   :  { %v974_v31 = vsel %vm973_vm1, %v966_v19, %v965_v63  ;;  %v921_v60 = vmul.f32 0.0625, %v889_v32  ;;  %v882_v33 = vadd.f32 %v881_v20, %v880_v12  ;;  %v861_v22 = vadd.f32 %v1297_v30, %v364_v44  ;;  %v1136_v44 = vld [vmem:[%s1855_s8] ss:$0 sm:$0xff] }
 0x2f3   :  { %v900_v24 = vrot.slane %v899_v55, 2  ;;  %v892_v27 = vadd.f32 %v891_v62, %v890_v13  ;;  %v834_v29 = vpop.f32.mrf.mxu0 }
 0x2f4   :  { %v920_v34 = vmul.f32 0.0625, %v882_v33  ;;  %v911_v11 = vadd.f32 %v861_v22, %v860_v28  ;;  %v859_v25 = vadd.f32 %v834_v29, %v362_v21  ;;  %v929_v35 = vpack.c.bf16 %v921_v60, %v921_v60 }
 0x2f5   :  { %v901_v36 = vadd.f32 %v900_v24, %v899_v55  ;;  %v893_v42 = vrot.slane %v892_v27, 2 }
 0x2f6   :  { %v928_v37 = vpack.c.bf16 %v920_v34, %v920_v34  ;;  %v912_v18 = vrot.slane %v911_v11, 4  ;;  %v904_v38 = vadd.f32 %v859_v25, %v858_v58  ;;  %v968_v45 = vunpack.c.l.b16 %v929_v35 }
 0x2f7   :  { %v902_v39 = vrot.slane %v901_v36, 1  ;;  %v894_v61 = vadd.f32 %v893_v42, %v892_v27 }
 0x2f8   :  { %v967_v56 = vunpack.c.l.b16 %v928_v37  ;;  %v913_v16 = vadd.f32 %v912_v18, %v911_v11  ;;  %v905_v40 = vrot.slane %v904_v38, 4 }
 0x2f9   :  { %v903_v26 = vadd.f32 %v902_v39, %v901_v36  ;;  %v895_v43 = vrot.slane %v894_v61, 1 }
 0x2fa   :  { %v976_v41 = vsel %vm975_vm2, %v967_v56, %v974_v31  ;;  %v914_v46 = vrot.slane %v913_v16, 2  ;;  %v906_v6 = vadd.f32 %v905_v40, %v904_v38 }
 0x2fb   :  { %v923_v49 = vmul.f32 0.0625, %v903_v26  ;;  %v896_v53 = vadd.f32 %v895_v43, %v894_v61  ;;  %v978_v54 = vsel %vm977_vm3, %v968_v45, %v976_v41 }
 0x2fc   :  { %v915_v14 = vadd.f32 %v914_v46, %v913_v16  ;;  %v907_v8 = vrot.slane %v906_v6, 2 }
 0x2fd   :  { %v922_v15 = vmul.f32 0.0625, %v896_v53  ;;  %v931_v59 = vpack.c.bf16 %v923_v49, %v923_v49 }
 0x2fe   :  { %v916_v47 = vrot.slane %v915_v14, 1  ;;  %v908_v23 = vadd.f32 %v907_v8, %v906_v6 }
 0x2ff   :  { %v930_v57 = vpack.c.bf16 %v922_v15, %v922_v15  ;;  %v970_v2 = vunpack.c.l.b16 %v931_v59 }
 0x300   :  { %v917_v0 = vadd.f32 %v916_v47, %v915_v14  ;;  %v909_v1 = vrot.slane %v908_v23, 1 }
 0x301   :  { %v969_v52 = vunpack.c.l.b16 %v930_v57 }
 0x302   :  { %v925_v3 = vmul.f32 0.0625, %v917_v0  ;;  %v910_v48 = vadd.f32 %v909_v1, %v908_v23 }
 0x303   :  { %v980_v4 = vsel %vm979_vm4, %v969_v52, %v978_v54 }
 0x304   :  { %v924_v5 = vmul.f32 0.0625, %v910_v48  ;;  %v982_v7 = vsel %vm981_vm5, %v970_v2, %v980_v4  ;;  %v933_v9 = vpack.c.bf16 %v925_v3, %v925_v3 }
 0x306   :  { %v932_v10 = vpack.c.bf16 %v924_v5, %v924_v5  ;;  %v972_v50 = vunpack.c.l.b16 %v933_v9 }
 0x308   :  { %v971_v12 = vunpack.c.l.b16 %v932_v10 }
 0x30a   :  { %v984_v51 = vsel %vm983_vm6, %v971_v12, %v982_v7 }
 0x30b   :  { %v986_v13 = vsel %vm985_vm7, %v972_v50, %v984_v51 }
 0x30c   :  { %v987_v17 = vpack.c.b16 %v986_v13, %v986_v13 }
 0x30e   :  { %1315 = vmatmul.mubr.bf16.vlgmr.msra.gmra.mxu1 %v987_v17 }
 0x3ce   :  { %v1071_v19 = vpop.f32.mrf.mxu1 }
 0x3cf   :  { %v1072_v63 = vadd.f32 %v1136_v44, %v1071_v19 }
 0x3d0   :  { %v1316_v32 = vpop.f32.mrf.mxu1 }
 0x3d1   :  { %v1077_v20 = vmul.f32 %v1072_v63, %v1072_v63 }
 0x3d2   :  { %v1074_v55 = vpop.f32.mrf.mxu1 }
 0x3d3   :  { %1078 = vadd.xlane.f32.xlu0 %v1077_v20 }
 0x3d4   :  { %v1317_v62 = vpop.f32.mrf.mxu1 }
 0x45c   :  { %v1079_v28 = vpop.xlane.xlu0 %1078 }
 0x45d   :  { %v1080_v30 = vmax.f32 %v1079_v28, 1e-24 }
 0x45f   :  { %1400 = vrsqrt.f32 %v1080_v30 }
 0x46c   :  { %v1401_v21 = vpop.eup %1400 }
 0x46d   :  { %v1082_v31 = vmul.f32 %v1401_v21, %v1072_v63 }
 0x46f   :  { %1083 = vst [vmem:[#allocation11] sm:$0xff] %v1082_v31 }
 0x470   :  { %1513 = shalt.err (!%p1510_p1)
}
 0x471   :  { %1093 = dma.vmem_to_hbm [thread:$0]  %s1091_s16, 128, %s1856_s9, [#allocation4]  }
 0x472   :  { %1528 = dma.done.wait [#allocation4], 128  }
 0x473   :  { %1529 = vsyncadd [#allocation4], 4294967168 }
 0x474   :  { %1097 = vsyncpa [#allocation3], 1 }
 0x475   :  { %1098 = vsyncpa [#allocation6], 1 }
 0x476   :  { %1099 = vsyncpa [#allocation9], 1 }
 0x477   :  { %1100 = vsyncpa [#allocation4], 1 }

</bundles_post_ra>
